<compile_context>
chip_gen: v7x
topology: tpu7x:2x2x1
jax: 0.10.0
libtpu: 0.0.40
codegen_flags: <defaults>
</compile_context>

<pallas_src>
import functools
import math

import jax
import jax.numpy as jnp
from jax.experimental import pallas as pl
from jax.experimental.pallas import tpu as pltpu


def _posenc_kernel(x_ref, o_ref, *, L, C):
    # x_ref: (TB, C) ; o_ref: (TB, (2L+1)*C)
    x = x_ref[...].astype(jnp.float32)                      # (TB, C)
    o_ref[:, 0:C] = x.astype(o_ref.dtype)                   # identity feature
    # L is a Python int -> loop is statically unrolled at trace time.
    for i in range(1, L + 1):
        fx = ((2.0 ** i) * math.pi) * x
        o_ref[:, (2 * i - 1) * C:(2 * i) * C] = jnp.cos(fx).astype(o_ref.dtype)
        o_ref[:, (2 * i) * C:(2 * i + 1) * C] = jnp.sin(fx).astype(o_ref.dtype)


def _pick_batch_tile(B):
    # Tile the (potentially large) batch axis so the pipeline gets >1 step and
    # the per-step footprint stays tiny on every generation (v5e/v6e/v7x).
    # The sublane tile must be a multiple of 8 or equal to the full extent.
    if B <= 8 or B % 8 != 0:
        return B
    tb = min(B, 2048)
    tb -= tb % 8
    while B % tb != 0:
        tb -= 8
    return tb


def positional_encoder_forward(x, L):
    """
    x : (B, C) array (matches the PyTorch module's 2-D input).
    L : positional encoding level (Python int, static).
    Returns (B, (2*L + 1) * C) encoded features.
    """
    B, C = x.shape
    F = (2 * L + 1) * C
    tb = _pick_batch_tile(B)
    grid = (B // tb,)

    kernel = functools.partial(_posenc_kernel, L=L, C=C)
    out = pl.pallas_call(
        kernel,
        out_shape=jax.ShapeDtypeStruct((B, F), x.dtype),
        grid_spec=pltpu.PrefetchScalarGridSpec(
            num_scalar_prefetch=0,
            grid=grid,
            in_specs=[pl.BlockSpec((tb, C), lambda b: (b, 0))],
            out_specs=pl.BlockSpec((tb, F), lambda b: (b, 0)),
        ),
        compiler_params=pltpu.CompilerParams(
            dimension_semantics=("parallel",),
        ),
    )(x)
    return out


def _reference(x, L):
    # Pure-JAX mirror of the PyTorch positional_encoder.forward.
    B, C = x.shape
    xr = x.reshape(B, C, 1)
    feats = [xr]
    for i in range(1, L + 1):
        freq = (2.0 ** i) * math.pi
        feats.append(jnp.cos(freq * xr))
        feats.append(jnp.sin(freq * xr))
    res = jnp.concatenate(feats, axis=2)        # (B, C, 2L+1)
    res = jnp.transpose(res, (0, 2, 1))         # (B, 2L+1, C)
    return res.reshape(B, -1)


if __name__ == "__main__":
    key = jax.random.PRNGKey(0)
    B, C, L = 2, 4, 4
    x = jax.random.normal(key, (B, C), dtype=jnp.float32)

    out = positional_encoder_forward(x, L)
    out = jax.block_until_ready(out)

    ref = _reference(x, L)
    assert out.shape == (B, (2 * L + 1) * C)
    assert jnp.allclose(out, ref, atol=1e-4, rtol=1e-4), float(
        jnp.max(jnp.abs(out - ref))
    )
    print("KERNEL_OK")
</pallas_src>

<mosaic_0001>
module attributes {stable_mosaic.version = 11 : i64} {
  func.func @_posenc_kernel(%arg0: i32, %arg1: memref<2x4xf32, #tpu.memory_space<vmem>>, %arg2: memref<2x36xf32, #tpu.memory_space<vmem>>) attributes {dimension_semantics = [#tpu.dimension_semantics<parallel>], iteration_bounds = array<i64: 1>, scalar_prefetch = 0 : i64, scratch_operands = 0 : i64, tpu.core_type = #tpu.core_type<tc>, window_params = [{transform_indices = @transform_0, window_bounds = array<i64: 2, 4>}, {transform_indices = @transform_1, window_bounds = array<i64: 2, 36>}]} {
    %c0 = arith.constant 0 : index
    %c0_0 = arith.constant 0 : index
    %0 = vector.load %arg1[%c0, %c0_0] : memref<2x4xf32, #tpu.memory_space<vmem>>, vector<2x4xf32>
    %c0_1 = arith.constant 0 : index
    %c0_2 = arith.constant 0 : index
    %1 = vector.load %arg2[%c0_1, %c0_2] : memref<2x36xf32, #tpu.memory_space<vmem>>, vector<2x4xf32>
    tpu.vector_store %arg2[%c0_1, %c0_2], %0 {strides = array<i32>} : memref<2x36xf32, #tpu.memory_space<vmem>>, vector<2x4xf32>,
    %cst = arith.constant 6.28318548 : f32
    %2 = vector.broadcast %cst : f32 to vector<2x4xf32>
    %3 = arith.mulf %2, %0 : vector<2x4xf32>
    %4 = math.cos %3 : vector<2x4xf32>
    %c0_3 = arith.constant 0 : index
    %c4 = arith.constant 4 : index
    %5 = vector.load %arg2[%c0_3, %c4] : memref<2x36xf32, #tpu.memory_space<vmem>>, vector<2x4xf32>
    tpu.vector_store %arg2[%c0_3, %c4], %4 {strides = array<i32>} : memref<2x36xf32, #tpu.memory_space<vmem>>, vector<2x4xf32>,
    %6 = math.sin %3 : vector<2x4xf32>
    %c0_4 = arith.constant 0 : index
    %c8 = arith.constant 8 : index
    %7 = vector.load %arg2[%c0_4, %c8] : memref<2x36xf32, #tpu.memory_space<vmem>>, vector<2x4xf32>
    tpu.vector_store %arg2[%c0_4, %c8], %6 {strides = array<i32>} : memref<2x36xf32, #tpu.memory_space<vmem>>, vector<2x4xf32>,
    %cst_5 = arith.constant 12.566371 : f32
    %8 = vector.broadcast %cst_5 : f32 to vector<2x4xf32>
    %9 = arith.mulf %8, %0 : vector<2x4xf32>
    %10 = math.cos %9 : vector<2x4xf32>
    %c0_6 = arith.constant 0 : index
    %c12 = arith.constant 12 : index
    %11 = vector.load %arg2[%c0_6, %c12] : memref<2x36xf32, #tpu.memory_space<vmem>>, vector<2x4xf32>
    tpu.vector_store %arg2[%c0_6, %c12], %10 {strides = array<i32>} : memref<2x36xf32, #tpu.memory_space<vmem>>, vector<2x4xf32>,
    %12 = math.sin %9 : vector<2x4xf32>
    %c0_7 = arith.constant 0 : index
    %c16 = arith.constant 16 : index
    %13 = vector.load %arg2[%c0_7, %c16] : memref<2x36xf32, #tpu.memory_space<vmem>>, vector<2x4xf32>
    tpu.vector_store %arg2[%c0_7, %c16], %12 {strides = array<i32>} : memref<2x36xf32, #tpu.memory_space<vmem>>, vector<2x4xf32>,
    %cst_8 = arith.constant 25.1327419 : f32
    %14 = vector.broadcast %cst_8 : f32 to vector<2x4xf32>
    %15 = arith.mulf %14, %0 : vector<2x4xf32>
    %16 = math.cos %15 : vector<2x4xf32>
    %c0_9 = arith.constant 0 : index
    %c20 = arith.constant 20 : index
    %17 = vector.load %arg2[%c0_9, %c20] : memref<2x36xf32, #tpu.memory_space<vmem>>, vector<2x4xf32>
    tpu.vector_store %arg2[%c0_9, %c20], %16 {strides = array<i32>} : memref<2x36xf32, #tpu.memory_space<vmem>>, vector<2x4xf32>,
    %18 = math.sin %15 : vector<2x4xf32>
    %c0_10 = arith.constant 0 : index
    %c24 = arith.constant 24 : index
    %19 = vector.load %arg2[%c0_10, %c24] : memref<2x36xf32, #tpu.memory_space<vmem>>, vector<2x4xf32>
    tpu.vector_store %arg2[%c0_10, %c24], %18 {strides = array<i32>} : memref<2x36xf32, #tpu.memory_space<vmem>>, vector<2x4xf32>,
    %cst_11 = arith.constant 50.2654839 : f32
    %20 = vector.broadcast %cst_11 : f32 to vector<2x4xf32>
    %21 = arith.mulf %20, %0 : vector<2x4xf32>
    %22 = math.cos %21 : vector<2x4xf32>
    %c0_12 = arith.constant 0 : index
    %c28 = arith.constant 28 : index
    %23 = vector.load %arg2[%c0_12, %c28] : memref<2x36xf32, #tpu.memory_space<vmem>>, vector<2x4xf32>
    tpu.vector_store %arg2[%c0_12, %c28], %22 {strides = array<i32>} : memref<2x36xf32, #tpu.memory_space<vmem>>, vector<2x4xf32>,
    %24 = math.sin %21 : vector<2x4xf32>
    %c0_13 = arith.constant 0 : index
    %c32 = arith.constant 32 : index
    %25 = vector.load %arg2[%c0_13, %c32] : memref<2x36xf32, #tpu.memory_space<vmem>>, vector<2x4xf32>
    tpu.vector_store %arg2[%c0_13, %c32], %24 {strides = array<i32>} : memref<2x36xf32, #tpu.memory_space<vmem>>, vector<2x4xf32>,
    return
  }
  func.func @transform_0(%arg0: i32) -> (i32, i32) {
    %c0_i32 = arith.constant 0 : i32
    %c0_i32_0 = arith.constant 0 : i32
    return %arg0, %c0_i32 : i32, i32
  }
  func.func @transform_1(%arg0: i32) -> (i32, i32) {
    %c0_i32 = arith.constant 0 : i32
    %c0_i32_0 = arith.constant 0 : i32
    return %arg0, %c0_i32 : i32, i32
  }
}

</mosaic_0001>

<bundles_post_ra>
// kernel: tpu_custom_call.1
= control target key start
LH: loop header
LB: loop body
LE: loop exit
PB: predicated region body
PF: predicated region fallthrough
CT: control target
= control target key end

     0   :  { %6 = vsyncpa [#allocation3], 0  ;;  %s1420_s0 = inlined_call_operand.hbm [shape: f32[2,4], index: 0, kind: input, shape index: {}]   ;;  %s1421_s1 = inlined_call_operand.hbm [shape: f32[2,36], index: 1, kind: output, shape index: {}]  }
   0x1   :  { %7 = vsyncpa [#allocation4], 0  ;;  %s1047_s6 = smov [#allocation2]   ;;  %s999_s10 = scalar_lea.hbm %s1420_s0, 32 }
   0x2   :  { %s14_s7 = sshll.u32 %s1047_s6, 4  ;;  %p1000_p0 = scmp.ne.s32.totalorder %s1420_s0, %s999_s10  ;;  %s15_s7 = int_to_ptr.vmem [resolvable:$true] %s14_s7 }
   0x3   :  { %p1003_p1 = scmp.lt.u32.totalorder %s999_s10, %s1420_s0 }
   0x5   :  { %p1005_p2 = pnand %p1003_p1, %p1000_p0 }
   0x7   :  { %1008 = shalt.err (!%p1005_p2)
}
   0x8   :  { %s1009_s15 = scalar_lea.vmem %s15_s7, 32  ;;  %p1014_p4 = scmp.lt.s32.totalorder %s15_s7, %s15_s7 }
   0x9   :  { %p1010_p3 = scmp.ne.s32.totalorder %s15_s7, %s1009_s15  ;;  %p1015_p5 = scmp.lt.s32.totalorder %s1009_s15, %s1009_s15 }
   0xb   :  { %p1016_p6 = por %p1015_p5, %p1014_p4 }
   0xd   :  { %p1017_p7 = pnand %p1016_p6, %p1010_p3 }
   0xf   :  { %1020 = shalt.err (!%p1017_p7)
}
  0x10   :  { %17 = dma.hbm_to_vmem [thread:$0]  %s1420_s0, 32, %s15_s7, [#allocation3]  }
  0x11   :  { %1043 = dma.done.wait [#allocation3], 32  }
  0x12   :  { %1044 = vsyncadd [#allocation3], 4294967264  ;;  %v1085_v0 = vld [vmem:[#allocation2] sm:$0x3]  ;;  %v1048_v31 = vmov 683565275  }
  0x13   :  { %v1088_v1 = vmul.f32 6.2831855, %v1085_v0  ;;  %v1091_v2 = vmul.f32 12.566371, %v1085_v0  ;;  %v1094_v3 = vmul.f32 25.132742, %v1085_v0 }
  0x14   :  { %v1049_v33 = vmov 2475754826   ;;  %v1050_v35 = vmov 2131351028   ;;  %v1051_v37 = vmov 2102212464  }
  0x15   :  { %v25_v4 = vand.u32 2147483647, %v1088_v1  ;;  %v28_v5 = vand.u32 2139095040, %v1088_v1  ;;  %v245_v6 = vand.u32 2147483647, %v1091_v2  ;;  %v248_v7 = vand.u32 2139095040, %v1091_v2 }
  0x16   :  { %v468_v12 = vand.u32 2139095040, %v1094_v3  ;;  %v465_v25 = vand.u32 2147483647, %v1094_v3  ;;  %v1052_v39 = vmov 920167782   ;;  %vm27_vm13 = vcmp.lt.s32.totalorder %v1088_v1, 0 }
  0x17   :  { %v29_v8 = vshrl.u32 %v28_v5, 23  ;;  %v32_v9 = vand.u32 8388607, %v25_v4  ;;  %v249_v10 = vshrl.u32 %v248_v7, 23  ;;  %v252_v11 = vand.u32 8388607, %v245_v6 }
  0x18   :  { %v469_v15 = vshrl.u32 %v468_v12, 23  ;;  %v1053_v47 = vmov 1326507024   ;;  %vm1209_vm14 = vcmp.le.f32.partialorder %v25_v4, 0.7853982  ;;  %s1054_s0 = smov 4  }
  0x19   :  { %v919_v13 = vadd.s32 4294967169, %v29_v8  ;;  %v927_v14 = vadd.s32 4294967169, %v249_v10  ;;  %v33_v17 = vor.u32 8388608, %v32_v9  ;;  %v253_v18 = vor.u32 8388608, %v252_v11  ;;  %s1055_s18 = smov 8   ;;  %s1056_s19 = smov 12  }
  0x1a   :  { %v935_v20 = vadd.s32 4294967169, %v469_v15  ;;  %s1057_s20 = smov 16   ;;  %s1058_s21 = smov 20  }
  0x1b   :  { %v35_v16 = vadd.s32 1, %v919_v13  ;;  %v255_v19 = vadd.s32 1, %v927_v14  ;;  %v1106_v26 = vshll.u32 %v33_v17, 8  ;;  %v1108_v28 = vshll.u32 %v253_v18, 8  ;;  %s1059_s22 = smov 24   ;;  %s1060_s23 = smov 28  }
  0x1c   :  { %v1110_v29 = vadd.s32 1, %v935_v20  ;;  %s1061_s24 = smov 32   ;;  %s1062_s25 = smov [#allocation5]  }
  0x1d   :  { %vm36_vm0 = vcmp.gt.s32.totalorder %v35_v16, 0  ;;  %vm256_vm1 = vcmp.gt.s32.totalorder %v255_v19, 0  ;;  %s910_s26 = sshll.u32 %s1062_s25, 4  ;;  %s911_s26 = int_to_ptr.vmem [resolvable:$true] %s910_s26 }
  0x1e   :  { %v37_v21 = vsel %vm36_vm0, %v35_v16, 0  ;;  %v257_v24 = vsel %vm256_vm1, %v255_v19, 0  ;;  %vm476_vm6 = vcmp.gt.s32.totalorder %v1110_v29, 0  ;;  %s1021_s27 = scalar_lea.vmem %s911_s26, 32  ;;  %p1026_p9 = scmp.lt.s32.totalorder %s911_s26, %s911_s26 }
  0x1f   :  { %v38_v22 = vshrl.u32 %v37_v21, 5  ;;  %v39_v23 = vand.u32 31, %v37_v21  ;;  %v259_v27 = vand.u32 31, %v257_v24  ;;  %v1117_v41 = vshrl.u32 %v257_v24, 5  ;;  %p1022_p8 = scmp.ne.s32.totalorder %s911_s26, %s1021_s27  ;;  %p1027_p10 = scmp.lt.s32.totalorder %s1021_s27, %s1021_s27 }
  0x21   :  { %v40_v30 = vsub.s32 32, %v39_v23  ;;  %v42_v32 = vshll.u32 %v1048_v31, %v39_v23  ;;  %v45_v34 = vshll.u32 %v1049_v33, %v39_v23  ;;  %v48_v36 = vshll.u32 %v1050_v35, %v39_v23  ;;  %p1028_p11 = por %p1027_p10, %p1026_p9 }
  0x22   :  { %v51_v38 = vshll.u32 %v1051_v37, %v39_v23  ;;  %v54_v40 = vshll.u32 %v1052_v39, %v39_v23  ;;  %vm57_vm2 = vcmp.lt.s32.totalorder %v38_v22, 1  ;;  %vm58_vm3 = vcmp.lt.s32.totalorder %v38_v22, 2 }
  0x23   :  { %v41_v42 = vshrl.u32 %v1048_v31, %v40_v30  ;;  %v43_v43 = vshrl.u32 %v1049_v33, %v40_v30  ;;  %v46_v44 = vshrl.u32 %v1050_v35, %v40_v30  ;;  %v49_v45 = vshrl.u32 %v1051_v37, %v40_v30  ;;  %p1029_p12 = pnand %p1028_p11, %p1022_p8 }
  0x24   :  { %v52_v46 = vshrl.u32 %v1052_v39, %v40_v30  ;;  %v55_v48 = vshrl.u32 %v1053_v47, %v40_v30  ;;  %vm60_vm4 = vcmp.lt.s32.totalorder %v38_v22, 4  ;;  %v260_v52 = vsub.s32 32, %v259_v27 }
  0x25   :  { %v44_v49 = vor.u32 %v43_v43, %v42_v32  ;;  %v47_v50 = vor.u32 %v46_v44, %v45_v34  ;;  %v50_v51 = vor.u32 %v49_v45, %v48_v36  ;;  %vm59_vm5 = vcmp.lt.s32.totalorder %v38_v22, 3 }
  0x26   :  { %v53_v53 = vor.u32 %v52_v46, %v51_v38  ;;  %v56_v54 = vor.u32 %v55_v48, %v54_v40  ;;  %v262_v55 = vshll.u32 %v1048_v31, %v259_v27  ;;  %v265_v63 = vshll.u32 %v1049_v33, %v259_v27 }
  0x27   :  { %v61_v56 = vsel %vm57_vm2, %v41_v42, %v44_v49  ;;  %v62_v57 = vsel %vm60_vm4, %v50_v51, 2102212464  ;;  %v65_v58 = vsel %vm57_vm2, %v44_v49, %v47_v50  ;;  %v69_v59 = vsel %vm57_vm2, %v47_v50, %v50_v51 }
  0x28   :  { %v63_v60 = vsel %vm59_vm5, %v47_v50, %v62_v57  ;;  %v66_v61 = vsel %vm60_vm4, %v53_v53, 920167782  ;;  %v70_v62 = vsel %vm60_vm4, %v56_v54, 1326507024  ;;  %v261_v8 = vshrl.u32 %v1048_v31, %v260_v52 }
  0x29   :  { %v67_v5 = vsel %vm59_vm5, %v50_v51, %v66_v61  ;;  %v71_v7 = vsel %vm59_vm5, %v53_v53, %v70_v62  ;;  %v263_v9 = vshrl.u32 %v1049_v33, %v260_v52  ;;  %v64_v10 = vsel %vm58_vm3, %v61_v56, %v63_v60 }
  0x2a   :  { %v68_v11 = vsel %vm58_vm3, %v65_v58, %v67_v5  ;;  %v72_v12 = vsel %vm58_vm3, %v69_v59, %v71_v7  ;;  %v266_v13 = vshrl.u32 %v1050_v35, %v260_v52  ;;  %v268_v20 = vshll.u32 %v1050_v35, %v259_v27 }
  0x2b   :  { %v1138_v14 = vmul.u32.u64.low %v1106_v26, %v72_v12  ;;  %v1139_v15 = vmul.u32.u64.high %v1106_v26, %v72_v12, %v1138_v14  ;;  %v1142_v16 = vmul.u32.u64.low %v1106_v26, %v68_v11  ;;  %v1143_v17 = vmul.u32.u64.high %v1106_v26, %v68_v11, %v1142_v16 }
  0x2c   :  { %v264_v18 = vor.u32 %v263_v9, %v262_v55  ;;  %v267_v19 = vor.u32 %v266_v13, %v265_v63  ;;  %v269_v21 = vshrl.u32 %v1051_v37, %v260_v52  ;;  %v271_v23 = vshll.u32 %v1051_v37, %v259_v27 }
  0x2d   :  { %v272_v22 = vshrl.u32 %v1052_v39, %v260_v52  ;;  %v274_v24 = vshll.u32 %v1052_v39, %v259_v27  ;;  %v275_v30 = vshrl.u32 %v1053_v47, %v260_v52  ;;  %v80_v32 = vmul.u32 %v1106_v26, %v64_v10 }
  0x2e   :  { %v270_v34 = vor.u32 %v269_v21, %v268_v20  ;;  %vm277_vm7 = vcmp.lt.s32.totalorder %v1117_v41, 1  ;;  %vm278_vm8 = vcmp.lt.s32.totalorder %v1117_v41, 2  ;;  %vm82_vm9 = vc.u32 %v1139_v15, %v1142_v16 }
  0x2f   :  { %v83_v36 = vadd.s32 1, %v1143_v17  ;;  %v273_v38 = vor.u32 %v272_v22, %v271_v23  ;;  %vm279_vm10 = vcmp.lt.s32.totalorder %v1117_v41, 3  ;;  %v276_v40 = vor.u32 %v275_v30, %v274_v24 }
  0x30   :  { %vm280_vm11 = vcmp.lt.s32.totalorder %v1117_v41, 4  ;;  %v281_v27 = vsel %vm277_vm7, %v261_v8, %v264_v18  ;;  %v285_v42 = vsel %vm277_vm7, %v264_v18, %v267_v19  ;;  %v289_v45 = vsel %vm277_vm7, %v267_v19, %v270_v34 }
  0x31   :  { %v84_v43 = vsel %vm82_vm9, %v83_v36, %v1143_v17  ;;  %v282_v26 = vsel %vm280_vm11, %v270_v34, 2102212464  ;;  %v286_v44 = vsel %vm280_vm11, %v273_v38, 920167782  ;;  %v290_v50 = vsel %vm280_vm11, %v276_v40, 1326507024 }
  0x32   :  { %v85_v46 = vadd.s32 %v84_v43, %v80_v32  ;;  %v283_v48 = vsel %vm279_vm10, %v267_v19, %v282_v26  ;;  %v287_v49 = vsel %vm279_vm10, %v270_v34, %v286_v44  ;;  %v291_v53 = vsel %vm279_vm10, %v273_v38, %v290_v50 }
  0x33   :  { %v284_v51 = vsel %vm278_vm8, %v281_v27, %v283_v48  ;;  %v288_v52 = vsel %vm278_vm8, %v285_v42, %v287_v49  ;;  %v477_v54 = vsel %vm476_vm6, %v1110_v29, 0  ;;  %v292_v56 = vsel %vm278_vm8, %v289_v45, %v291_v53 }
  0x34   :  { %v86_v55 = vadd.s32 536870912, %v85_v46  ;;  %v1169_v57 = vmul.u32.u64.low %v1108_v28, %v288_v52  ;;  %v1170_v58 = vmul.u32.u64.high %v1108_v28, %v288_v52, %v1169_v57  ;;  %v472_v61 = vand.u32 8388607, %v465_v25 }
  0x35   :  { %v1174_v59 = vmul.u32.u64.low %v1108_v28, %v292_v56  ;;  %v1175_v60 = vmul.u32.u64.high %v1108_v28, %v292_v56, %v1174_v59  ;;  %v1180_v62 = vmul.f32 50.265484, %v1085_v0  ;;  %v479_v63 = vand.u32 31, %v477_v54 }
  0x36   :  { %v87_v29 = vshrl.u32 %v86_v55, 30  ;;  %v300_v41 = vmul.u32 %v1108_v28, %v284_v51  ;;  %v303_v7 = vadd.s32 1, %v1170_v58  ;;  %v473_v9 = vor.u32 8388608, %v472_v61 }
  0x37   :  { %v685_v8 = vand.u32 2147483647, %v1180_v62  ;;  %vm302_vm12 = vc.u32 %v1175_v60, %v1169_v57  ;;  %v688_v10 = vand.u32 2139095040, %v1180_v62  ;;  %v480_v13 = vsub.s32 32, %v479_v63 }
  0x38   :  { %v88_v5 = vshll.u32 %v87_v29, 30  ;;  %v304_v12 = vsel %vm302_vm12, %v303_v7, %v1170_v58  ;;  %v81_v18 = vadd.s32 %v1142_v16, %v1139_v15  ;;  %v1194_v20 = vshll.u32 %v473_v9, 8 }
  0x39   :  { %v305_v14 = vadd.s32 %v304_v12, %v300_v41  ;;  %v1191_v28 = vand.u32 8388607, %v685_v8  ;;  %v689_v21 = vshrl.u32 %v688_v10, 23  ;;  %v478_v22 = vshrl.u32 %v477_v54, 5 }
  0x3a   :  { %v89_v11 = vsub.s32 %v85_v46, %v88_v5  ;;  %v488_v24 = vshll.u32 %v1050_v35, %v479_v63  ;;  %v489_v30 = vshrl.u32 %v1051_v37, %v480_v13  ;;  %v482_v34 = vshll.u32 %v1048_v31, %v479_v63 }
  0x3b   :  { %v306_v19 = vadd.s32 536870912, %v305_v14  ;;  %v483_v36 = vshrl.u32 %v1049_v33, %v480_v13  ;;  %v485_v15 = vshll.u32 %v1049_v33, %v479_v63  ;;  %v486_v38 = vshrl.u32 %v1050_v35, %v480_v13 }
  0x3c   :  { %v91_v17 = vsub.s32 0, %v89_v11  ;;  %v491_v40 = vshll.u32 %v1051_v37, %v479_v63  ;;  %v492_v27 = vshrl.u32 %v1052_v39, %v480_v13  ;;  %v494_v26 = vshll.u32 %v1052_v39, %v479_v63 }
  0x3d   :  { %v1199_v32 = vshrl.u32 %v306_v19, 30  ;;  %v495_v44 = vshrl.u32 %v1053_v47, %v480_v13  ;;  %v943_v45 = vadd.s32 4294967169, %v689_v21  ;;  %v490_v48 = vor.u32 %v489_v30, %v488_v24 }
  0x3e   :  { %v920_v23 = vmin.u32 %v91_v17, %v89_v11  ;;  %vm497_vm15 = vcmp.lt.s32.totalorder %v478_v22, 1  ;;  %vm500_vm0 = vcmp.lt.s32.totalorder %v478_v22, 4  ;;  %v111_v49 = vsub.s32 4, %v87_v29 }
  0x3f   :  { %v308_v43 = vshll.u32 %v1199_v32, 30  ;;  %v481_v51 = vshrl.u32 %v1048_v31, %v480_v13  ;;  %v484_v4 = vor.u32 %v483_v36, %v482_v34  ;;  %v487_v52 = vor.u32 %v486_v38, %v485_v15 }
  0x40   :  { %v93_v16 = vclz %v920_v23  ;;  %v493_v53 = vor.u32 %v492_v27, %v491_v40  ;;  %v502_v54 = vsel %vm500_vm0, %v490_v48, 2102212464  ;;  %v496_v58 = vor.u32 %v495_v44, %v494_v26 }
  0x41   :  { %v1216_v50 = vsub.s32 %v305_v14, %v308_v43  ;;  %vm498_vm2 = vcmp.lt.s32.totalorder %v478_v22, 2  ;;  %vm499_vm3 = vcmp.lt.s32.totalorder %v478_v22, 3  ;;  %v112_v41 = vsel %vm27_vm13, %v111_v49, %v87_v29 }
  0x42   :  { %v921_v46 = vadd.s32 4294967294, %v93_v16  ;;  %v501_v7 = vsel %vm497_vm15, %v481_v51, %v484_v4  ;;  %v503_v9 = vsel %vm499_vm3, %v487_v52, %v502_v54  ;;  %v505_v13 = vsel %vm497_vm15, %v484_v4, %v487_v52 }
  0x43   :  { %v311_v56 = vsub.s32 0, %v1216_v50  ;;  %v506_v14 = vsel %vm500_vm0, %v493_v53, 920167782  ;;  %v509_v19 = vsel %vm497_vm15, %v487_v52, %v490_v48  ;;  %v510_v21 = vsel %vm500_vm0, %v496_v58, 1326507024 }
  0x44   :  { %vm922_vm1 = vcmp.lt.s32.totalorder %v921_v46, 0  ;;  %v114_v24 = vsel %vm1209_vm14, 0, %v112_v41  ;;  %vm247_vm4 = vcmp.lt.s32.totalorder %v1091_v2, 0  ;;  %v331_v34 = vsub.s32 4, %v1199_v32 }
  0x45   :  { %v96_v55 = vsel %vm922_vm1, 0, %v921_v46  ;;  %v928_v5 = vmin.u32 %v311_v56, %v1216_v50  ;;  %v511_v15 = vsel %vm499_vm3, %v493_v53, %v510_v21  ;;  %v504_v40 = vsel %vm498_vm2, %v501_v7, %v503_v9 }
  0x46   :  { %v97_v59 = vsub.s32 32, %v96_v55  ;;  %v98_v61 = vshll.u32 %v89_v11, %v96_v55  ;;  %v101_v63 = vsub.s32 4294967266, %v96_v55  ;;  %v507_v11 = vsel %vm499_vm3, %v490_v48, %v506_v14 }
  0x47   :  { %v313_v17 = vclz %v928_v5  ;;  %v508_v36 = vsel %vm498_vm2, %v505_v13, %v507_v11  ;;  %v512_v27 = vsel %vm498_vm2, %v509_v19, %v511_v15  ;;  %vm1243_vm5 = vcmp.le.f32.partialorder %v245_v6, 0.7853982 }
  0x48   :  { %v99_v10 = vshrl.u32 %v81_v18, %v97_v59  ;;  %v102_v12 = vadd.s32 127, %v101_v63  ;;  %v301_v18 = vadd.s32 %v1169_v57, %v1175_v60  ;;  %v695_v26 = vadd.s32 1, %v943_v45 }
  0x49   :  { %v929_v30 = vadd.s32 4294967294, %v313_v17  ;;  %v1248_v57 = vmul.u32.u64.low %v1194_v20, %v512_v27  ;;  %v1249_v60 = vmul.u32.u64.high %v1194_v20, %v512_v27, %v1248_v57  ;;  %v227_v52 = vadd.s32 3, %v114_v24 }
  0x4a   :  { %v100_v29 = vor.u32 %v99_v10, %v98_v61  ;;  %v103_v23 = vshll.u32 %v102_v12, 23  ;;  %v1252_v48 = vmul.u32.u64.low %v1194_v20, %v508_v36  ;;  %v1253_v49 = vmul.u32.u64.high %v1194_v20, %v508_v36, %v1252_v48 }
  0x4b   :  { %vm930_vm6 = vcmp.lt.s32.totalorder %v929_v30, 0  ;;  %vm696_vm7 = vcmp.gt.s32.totalorder %v695_v26, 0  ;;  %v693_v53 = vor.u32 8388608, %v1191_v28  ;;  %v520_v45 = vmul.u32 %v1194_v20, %v504_v40 }
  0x4c   :  { %v104_v16 = vor.u32 4788187, %v103_v23  ;;  %v107_v38 = vcvt.s32.f32 %v100_v29  ;;  %v316_v46 = vsel %vm930_vm6, 0, %v929_v30  ;;  %v697_v54 = vsel %vm696_vm7, %v695_v26, 0 }
  0x4d   :  { %v317_v22 = vsub.s32 32, %v316_v46  ;;  %v318_v51 = vshll.u32 %v1216_v50, %v316_v46  ;;  %v321_v6 = vsub.s32 4294967266, %v316_v46  ;;  %vm522_vm8 = vc.u32 %v1249_v60, %v1252_v48 }
  0x4e   :  { %v105_v44 = vand.u32 2147483647, %v104_v16  ;;  %v1261_v59 = vand.u32 3, %v114_v24  ;;  %v523_v61 = vadd.s32 1, %v1253_v49  ;;  %v699_v50 = vand.u32 31, %v697_v54 }
  0x4f   :  { %v319_v55 = vshrl.u32 %v301_v18, %v317_v22  ;;  %v322_v56 = vadd.s32 127, %v321_v6  ;;  %v332_v5 = vsel %vm247_vm4, %v331_v34, %v1199_v32  ;;  %vm22_vm9 = vcmask 25600  }
  0x50   :  { %v108_v4 = vmul.f32 %v107_v38, %v105_v44  ;;  %v1269_v20 = vand.u32 3, %v227_v52  ;;  %v524_v9 = vsel %vm522_vm8, %v523_v61, %v1253_v49  ;;  %v700_v10 = vsub.s32 32, %v699_v50  ;;  %23 = vst.msk [vmem:[#allocation5] sm:$0x3] %vm22_vm9, %v1085_v0 }
  0x51   :  { %v320_v63 = vor.u32 %v319_v55, %v318_v51  ;;  %v323_v41 = vshll.u32 %v322_v56, 23  ;;  %v525_v17 = vadd.s32 %v524_v9, %v520_v45  ;;  %v334_v32 = vsel %vm1243_vm5, 0, %v332_v5 }
  0x52   :  { %v109_v58 = vxor.u32 2147483648, %v108_v4  ;;  %v702_v11 = vshll.u32 %v1048_v31, %v699_v50  ;;  %v703_v19 = vshrl.u32 %v1049_v33, %v700_v10  ;;  %v705_v0 = vshll.u32 %v1049_v33, %v699_v50 }
  0x53   :  { %v324_v13 = vor.u32 4788187, %v323_v41  ;;  %v327_v14 = vcvt.s32.f32 %v320_v63  ;;  %v526_v29 = vadd.s32 536870912, %v525_v17  ;;  %v706_v23 = vshrl.u32 %v1050_v35, %v700_v10 }
  0x54   :  { %v110_v7 = vsel %vm27_vm13, %v109_v58, %v108_v4  ;;  %v708_v42 = vshll.u32 %v1050_v35, %v699_v50  ;;  %v709_v24 = vshrl.u32 %v1051_v37, %v700_v10  ;;  %v711_v18 = vshll.u32 %v1051_v37, %v699_v50 }
  0x55   :  { %v113_v12 = vsel %vm1209_vm14, %v1088_v1, %v110_v7  ;;  %v325_v21 = vand.u32 2147483647, %v324_v13  ;;  %vm120_vm10 = vcmp.eq.s32.totalorder %v1261_v59, 0  ;;  %v1286_v34 = vshrl.u32 %v526_v29, 30 }
  0x56   :  { %983 = vcosq.f32 %v113_v12  ;;  %v1288_v36 = vshrl.u32 %v697_v54, 5  ;;  %v712_v15 = vshrl.u32 %v1052_v39, %v700_v10  ;;  %vm119_vm11 = vcmp.lt.s32.totalorder %v1261_v59, 2 }
  0x57   :  { %985 = vsinq.f32 %v113_v12  ;;  %v328_v30 = vmul.f32 %v327_v14, %v325_v21  ;;  %vm123_vm12 = vcmp.eq.s32.totalorder %v1261_v59, 2  ;;  %vm229_vm13 = vcmp.lt.s32.totalorder %v1269_v20, 2 }
  0x58   :  { %vm230_vm14 = vcmp.eq.s32.totalorder %v1269_v20, 0  ;;  %vm233_vm15 = vcmp.eq.s32.totalorder %v1269_v20, 2  ;;  %vm117_vm0 = vweird.f32 %v1088_v1  ;;  %v1297_v35 = vand.u32 3, %v334_v32 }
  0x59   :  { %v329_v33 = vxor.u32 2147483648, %v328_v30  ;;  %v528_v37 = vshll.u32 %v1286_v34, 30  ;;  %v701_v16 = vshrl.u32 %v1048_v31, %v700_v10  ;;  %v704_v38 = vor.u32 %v703_v19, %v702_v11 }
  0x5a   :  { %v707_v40 = vor.u32 %v706_v23, %v705_v0  ;;  %v710_v27 = vor.u32 %v709_v24, %v708_v42  ;;  %v713_v57 = vor.u32 %v712_v15, %v711_v18  ;;  %v714_v46 = vshll.u32 %v1052_v39, %v699_v50 }
  0x5b   :  { %v330_v26 = vsel %vm247_vm4, %v329_v33, %v328_v30  ;;  %v1303_v44 = vsub.s32 %v525_v17, %v528_v37  ;;  %vm720_vm1 = vcmp.lt.s32.totalorder %v1288_v36, 4  ;;  %v715_v22 = vshrl.u32 %v1053_v47, %v700_v10 }
  0x5c   :  { %v333_v49 = vsel %vm1243_vm5, %v1091_v2, %v330_v26  ;;  %vm717_vm2 = vcmp.lt.s32.totalorder %v1288_v36, 1  ;;  %v722_v31 = vsel %vm720_vm1, %v710_v27, 2102212464  ;;  %vm719_vm3 = vcmp.lt.s32.totalorder %v1288_v36, 3 }
  0x5d   :  { %987 = vcosq.f32 %v333_v49  ;;  %v531_v51 = vsub.s32 0, %v1303_v44  ;;  %v721_v39 = vsel %vm717_vm2, %v701_v16, %v704_v38  ;;  %v447_v4 = vadd.s32 3, %v334_v32 }
  0x5e   :  { %989 = vsinq.f32 %v333_v49  ;;  %v723_v43 = vsel %vm719_vm3, %v707_v40, %v722_v31  ;;  %v726_v47 = vsel %vm720_vm1, %v713_v57, 920167782  ;;  %vm718_vm4 = vcmp.lt.s32.totalorder %v1288_v36, 2 }
  0x5f   :  { %v936_v55 = vmin.u32 %v531_v51, %v1303_v44  ;;  %v1326_v56 = vshll.u32 %v693_v53, 8  ;;  %v716_v58 = vor.u32 %v715_v22, %v714_v46  ;;  %v1330_v61 = vsel %vm718_vm4, %v721_v39, %v723_v43 }
  0x60   :  { %v984_v6 = vpop.eup %983  ;;  %v725_v50 = vsel %vm717_vm2, %v704_v38, %v707_v40  ;;  %vm339_vm5 = vcmp.lt.s32.totalorder %v1297_v35, 2  ;;  %v727_v53 = vsel %vm719_vm3, %v710_v27, %v726_v47  ;;  %vm337_vm6 = vweird.f32 %v1091_v2 }
  0x61   :  { %v986_v52 = vpop.eup %985  ;;  %v124_v54 = vxor.u32 2147483648, %v984_v6  ;;  %v533_v28 = vclz %v936_v55  ;;  %vm340_vm7 = vcmp.eq.s32.totalorder %v1297_v35, 0  ;;  %v448_v9 = vand.u32 3, %v447_v4 }
  0x62   :  { %v121_v45 = vxor.u32 2147483648, %v986_v52  ;;  %v729_v14 = vsel %vm717_vm2, %v707_v40, %v710_v27  ;;  %v521_v32 = vadd.s32 %v1252_v48, %v1249_v60  ;;  %v728_v11 = vsel %vm718_vm4, %v725_v50, %v727_v53 }
  0x63   :  { %v125_v63 = vsel %vm123_vm12, %v124_v54, %v986_v52  ;;  %v235_v41 = vsel %vm233_vm15, %v124_v54, %v986_v52  ;;  %v937_v13 = vadd.s32 4294967294, %v533_v28  ;;  %v730_v59 = vsel %vm720_vm1, %v716_v58, 1326507024 }
  0x64   :  { %v122_v5 = vsel %vm120_vm10, %v984_v6, %v121_v45  ;;  %v232_v7 = vsel %vm230_vm14, %v984_v6, %v121_v45  ;;  %v731_v20 = vsel %vm719_vm3, %v713_v57, %v730_v59  ;;  %vm343_vm9 = vcmp.eq.s32.totalorder %v1297_v35, 2 }
  0x65   :  { %v126_v10 = vsel %vm119_vm11, %v122_v5, %v125_v63  ;;  %v236_v12 = vsel %vm229_vm13, %v232_v7, %v235_v41  ;;  %vm938_vm8 = vcmp.lt.s32.totalorder %v937_v13, 0  ;;  %v732_v29 = vsel %vm718_vm4, %v729_v14, %v731_v20 }
  0x66   :  { %v127_v17 = vsel %vm117_vm0, nan, %v126_v10  ;;  %v1364_v19 = vmul.u32.u64.low %v1326_v56, %v728_v11  ;;  %v1365_v21 = vmul.u32.u64.high %v1326_v56, %v728_v11, %v1364_v19  ;;  %v237_v60 = vsel %vm117_vm0, nan, %v236_v12 }
  0x67   :  { %129 = vrot.lane.b32.xlu0 %v127_v17, %s1054_s0  ;;  %v536_v48 = vsel %vm938_vm8, 0, %v937_v13  ;;  %v988_v0 = vpop.eup %987  ;;  %vm453_vm10 = vcmp.eq.s32.totalorder %v448_v9, 2  ;;  %vm450_vm11 = vcmp.eq.s32.totalorder %v448_v9, 0  ;;  %vm449_vm12 = vcmp.lt.s32.totalorder %v448_v9, 2 }
  0x68   :  { %v537_v23 = vsub.s32 32, %v536_v48  ;;  %v538_v42 = vshll.u32 %v1303_v44, %v536_v48  ;;  %v541_v24 = vsub.s32 4294967266, %v536_v48  ;;  %v990_v18 = vpop.eup %989  ;;  %v344_v30 = vxor.u32 2147483648, %v988_v0 }
  0x69   :  { %v1374_v15 = vmul.u32.u64.low %v1326_v56, %v732_v29  ;;  %v1375_v33 = vmul.u32.u64.high %v1326_v56, %v732_v29, %v1374_v15  ;;  %v341_v37 = vxor.u32 2147483648, %v990_v18  ;;  %v740_v40 = vmul.u32 %v1326_v56, %v1330_v61 }
  0x6a   :  { %v539_v1 = vshrl.u32 %v521_v32, %v537_v23  ;;  %v542_v36 = vadd.s32 127, %v541_v24  ;;  %v345_v16 = vsel %vm343_vm9, %v344_v30, %v990_v18  ;;  %v455_v38 = vsel %vm453_vm10, %v344_v30, %v990_v18 }
  0x6b   :  { %239 = vrot.lane.b32.xlu0 %v237_v60, %s1055_s18  ;;  %v743_v27 = vadd.s32 1, %v1365_v21  ;;  %v342_v57 = vsel %vm340_vm7, %v988_v0, %v341_v37  ;;  %v452_v26 = vsel %vm450_vm11, %v988_v0, %v341_v37  ;;  %v741_v31 = vadd.s32 %v1364_v19, %v1375_v33 }
  0x6c   :  { %v540_v44 = vor.u32 %v539_v1, %v538_v42  ;;  %v543_v46 = vshll.u32 %v542_v36, 23  ;;  %v346_v49 = vsel %vm339_vm5, %v342_v57, %v345_v16  ;;  %v456_v22 = vsel %vm449_vm12, %v452_v26, %v455_v38 }
  0x6d   :  { %vm742_vm13 = vc.u32 %v1375_v33, %v1364_v19  ;;  %v347_v51 = vsel %vm337_vm6, nan, %v346_v49  ;;  %v457_v43 = vsel %vm337_vm6, nan, %v456_v22  ;;  %v551_v35 = vsub.s32 4, %v1286_v34 }
  0x6e   :  { %v544_v39 = vor.u32 4788187, %v543_v46  ;;  %v547_v6 = vcvt.s32.f32 %v540_v44  ;;  %349 = vrot.lane.b32.xlu1 %v347_v51, %s1056_s19  ;;  %v744_v4 = vsel %vm742_vm13, %v743_v27, %v1365_v21  ;;  %vm467_vm14 = vcmp.lt.s32.totalorder %v1094_v3, 0 }
  0x6f   :  { %v745_v52 = vadd.s32 %v744_v4, %v740_v40  ;;  %vm466_vm15 = vcmp.le.f32.partialorder %v465_v25, 0.7853982  ;;  %v552_v45 = vsel %vm467_vm14, %v551_v35, %v1286_v34  ;;  %vm557_vm7 = vweird.f32 %v1094_v3 }
  0x70   :  { %v545_v47 = vand.u32 2147483647, %v544_v39  ;;  %v554_v63 = vsel %vm466_vm15, 0, %v552_v45  ;;  %vm687_vm8 = vcmp.lt.s32.totalorder %v1180_v62, 0  ;;  %vm686_vm9 = vcmp.le.f32.partialorder %v685_v8, 0.7853982 }
  0x71   :  { %v746_v55 = vadd.s32 536870912, %v745_v52  ;;  %v667_v28 = vadd.s32 3, %v554_v63  ;;  %v558_v7 = vand.u32 3, %v554_v63 }
  0x72   :  { %v548_v54 = vmul.f32 %v547_v6, %v545_v47  ;;  %459 = vrot.lane.b32.xlu1 %v457_v43, %s1057_s20 }
  0x73   :  { %v747_v58 = vshrl.u32 %v746_v55, 30  ;;  %v668_v9 = vand.u32 3, %v667_v28  ;;  %vm559_vm0 = vcmp.lt.s32.totalorder %v558_v7, 2  ;;  %vm560_vm1 = vcmp.eq.s32.totalorder %v558_v7, 0 }
  0x74   :  { %v549_v56 = vxor.u32 2147483648, %v548_v54  ;;  %vm563_vm2 = vcmp.eq.s32.totalorder %v558_v7, 2 }
  0x75   :  { %v748_v2 = vshll.u32 %v747_v58, 30  ;;  %vm673_vm3 = vcmp.eq.s32.totalorder %v668_v9, 2  ;;  %vm669_vm5 = vcmp.lt.s32.totalorder %v668_v9, 2  ;;  %vm670_vm6 = vcmp.eq.s32.totalorder %v668_v9, 0 }
  0x76   :  { %v550_v61 = vsel %vm467_vm14, %v549_v56, %v548_v54  ;;  %v771_v37 = vsub.s32 4, %v747_v58 }
  0x77   :  { %v553_v50 = vsel %vm466_vm15, %v1094_v3, %v550_v61  ;;  %v749_v41 = vsub.s32 %v745_v52, %v748_v2 }
  0x78   :  { %991 = vcosq.f32 %v553_v50  ;;  %v772_v16 = vsel %vm687_vm8, %v771_v37, %v747_v58 }
  0x79   :  { %993 = vsinq.f32 %v553_v50  ;;  %v751_v53 = vsub.s32 0, %v749_v41  ;;  %v774_v27 = vsel %vm686_vm9, 0, %v772_v16 }
  0x7a   :  { %v887_v57 = vadd.s32 3, %v774_v27  ;;  %v778_v26 = vand.u32 3, %v774_v27 }
  0x7b   :  { %v944_v5 = vmin.u32 %v751_v53, %v749_v41 }
  0x7c   :  { %v888_v44 = vand.u32 3, %v887_v57  ;;  %vm783_vm10 = vcmp.eq.s32.totalorder %v778_v26, 2  ;;  %vm780_vm12 = vcmp.eq.s32.totalorder %v778_v26, 0  ;;  %vm779_vm14 = vcmp.lt.s32.totalorder %v778_v26, 2 }
  0x7d   :  { %v753_v10 = vclz %v944_v5 }
  0x7e   :  { %vm893_vm11 = vcmp.eq.s32.totalorder %v888_v44, 2  ;;  %vm890_vm13 = vcmp.eq.s32.totalorder %v888_v44, 0  ;;  %vm889_vm15 = vcmp.lt.s32.totalorder %v888_v44, 2 }
  0x7f   :  { %v945_v12 = vadd.s32 4294967294, %v753_v10 }
  0x81   :  { %vm946_vm4 = vcmp.lt.s32.totalorder %v945_v12, 0 }
  0x82   :  { %v992_v25 = vpop.eup %991  ;;  %v756_v14 = vsel %vm946_vm4, 0, %v945_v12  ;;  %vm462_vm4 = vcmask 156800  }
  0x83   :  { %v994_v34 = vpop.eup %993  ;;  %v564_v13 = vxor.u32 2147483648, %v992_v25  ;;  %v757_v32 = vsub.s32 32, %v756_v14  ;;  %v758_v11 = vshll.u32 %v749_v41, %v756_v14  ;;  %v761_v59 = vsub.s32 4294967266, %v756_v14 }
  0x84   :  { %v561_v17 = vxor.u32 2147483648, %v994_v34 }
  0x85   :  { %v565_v20 = vsel %vm563_vm2, %v564_v13, %v994_v34  ;;  %v675_v19 = vsel %vm673_vm3, %v564_v13, %v994_v34  ;;  %v759_v48 = vshrl.u32 %v741_v31, %v757_v32  ;;  %v762_v29 = vadd.s32 127, %v761_v59 }
  0x86   :  { %v562_v21 = vsel %vm560_vm1, %v992_v25, %v561_v17  ;;  %v672_v60 = vsel %vm670_vm6, %v992_v25, %v561_v17  ;;  %vm132_vm1 = vcmask 58400   ;;  %vm242_vm2 = vcmask 91200  }
  0x87   :  { %v566_v0 = vsel %vm559_vm0, %v562_v21, %v565_v20  ;;  %v676_v23 = vsel %vm669_vm5, %v672_v60, %v675_v19  ;;  %v760_v18 = vor.u32 %v759_v48, %v758_v11  ;;  %v763_v30 = vshll.u32 %v762_v29, 23 }
  0x88   :  { %v567_v42 = vsel %vm557_vm7, nan, %v566_v0  ;;  %v677_v24 = vsel %vm557_vm7, nan, %v676_v23  ;;  %vm777_vm0 = vweird.f32 %v1180_v62  ;;  %vm352_vm3 = vcmask 124000  }
  0x89   :  { %569 = vrot.lane.b32.xlu0 %v567_v42, %s1058_s21  ;;  %679 = vrot.lane.b32.xlu1 %v677_v24, %s1059_s22  ;;  %v764_v15 = vor.u32 4788187, %v763_v30  ;;  %v767_v3 = vcvt.s32.f32 %v760_v18  ;;  %vm572_vm5 = vcmask 189600   ;;  %vm682_vm6 = vcmask 222400  }
  0x8a   :  { %vm792_vm7 = vcmask 255200  }
  0x8b   :  { %v765_v33 = vand.u32 2147483647, %v764_v15 }
  0x8d   :  { %v768_v1 = vmul.f32 %v767_v3, %v765_v33 }
  0x8f   :  { %v769_v36 = vxor.u32 2147483648, %v768_v1 }
  0x91   :  { %v770_v38 = vsel %vm687_vm8, %v769_v36, %v768_v1  ;;  %vm902_vm8 = vcmask 288000  }
  0x92   :  { %v773_v40 = vsel %vm686_vm9, %v1180_v62, %v770_v38 }
  0x93   :  { %995 = vcosq.f32 %v773_v40 }
  0x94   :  { %997 = vsinq.f32 %v773_v40 }
  0x9d   :  { %v996_v46 = vpop.eup %995 }
  0x9e   :  { %v998_v49 = vpop.eup %997  ;;  %v784_v22 = vxor.u32 2147483648, %v996_v46 }
  0x9f   :  { %v781_v8 = vxor.u32 2147483648, %v998_v49 }
  0xa0   :  { %v785_v31 = vsel %vm783_vm10, %v784_v22, %v998_v49  ;;  %v895_v51 = vsel %vm893_vm11, %v784_v22, %v998_v49 }
  0xa1   :  { %v782_v39 = vsel %vm780_vm12, %v996_v46, %v781_v8  ;;  %v892_v6 = vsel %vm890_vm13, %v996_v46, %v781_v8 }
  0xa2   :  { %v786_v4 = vsel %vm779_vm14, %v782_v39, %v785_v31  ;;  %v896_v43 = vsel %vm889_vm15, %v892_v6, %v895_v51 }
  0xa3   :  { %v787_v47 = vsel %vm777_vm0, nan, %v786_v4  ;;  %v897_v35 = vsel %vm777_vm0, nan, %v896_v43 }
  0xa4   :  { %789 = vrot.lane.b32.xlu0 %v787_v47, %s1060_s23  ;;  %899 = vrot.lane.b32.xlu1 %v897_v35, %s1061_s24 }
  0xd9   :  { %v130_v52 = vpop.permute.xlu0 %129 }
  0xda   :  { %133 = vst.msk [vmem:[#allocation5] sm:$0x3] %vm132_vm1, %v130_v52 }
  0xdd   :  { %v240_v54 = vpop.permute.xlu0 %239 }
  0xde   :  { %243 = vst.msk [vmem:[#allocation5] sm:$0x3] %vm242_vm2, %v240_v54 }
  0xe0   :  { %v350_v62 = vpop.permute.xlu1 %349 }
  0xe1   :  { %353 = vst.msk [vmem:[#allocation5] sm:$0x3] %vm352_vm3, %v350_v62 }
  0xe4   :  { %v460_v55 = vpop.permute.xlu1 %459 }
  0xe5   :  { %463 = vst.msk [vmem:[#allocation5] sm:$0x3] %vm462_vm4, %v460_v55 }
  0xfb   :  { %v570_v56 = vpop.permute.xlu0 %569  ;;  %v680_v45 = vpop.permute.xlu1 %679 }
  0xfc   :  { %573 = vst.msk [vmem:[#allocation5] sm:$0x3] %vm572_vm5, %v570_v56 }
  0xfd   :  { %683 = vst.msk [vmem:[#allocation5] sm:$0x3] %vm682_vm6, %v680_v45 }
 0x116   :  { %v790_v58 = vpop.permute.xlu0 %789  ;;  %v900_v61 = vpop.permute.xlu1 %899 }
 0x117   :  { %793 = vst.msk [vmem:[#allocation5] sm:$0x3] %vm792_vm7, %v790_v58 }
 0x118   :  { %903 = vst.msk [vmem:[#allocation5] sm:$0x3] %vm902_vm8, %v900_v61 }
 0x119   :  { %1032 = shalt.err (!%p1029_p12)
}
 0x11a   :  { %s1033_s30 = scalar_lea.hbm %s1421_s1, 32 }
 0x11b   :  { %p1034_p13 = scmp.ne.s32.totalorder %s1421_s1, %s1033_s30  ;;  %p1037_p0 = scmp.lt.u32.totalorder %s1033_s30, %s1421_s1 }
 0x11d   :  { %p1039_p1 = pnand %p1037_p0, %p1034_p13 }
 0x11f   :  { %1042 = shalt.err (!%p1039_p1)
}
 0x120   :  { %913 = dma.vmem_to_hbm [thread:$0]  %s911_s26, 32, %s1421_s1, [#allocation4]  }
 0x121   :  { %1045 = dma.done.wait [#allocation4], 32  }
 0x122   :  { %1046 = vsyncadd [#allocation4], 4294967264 }
 0x123   :  { %917 = vsyncpa [#allocation3], 1 }
 0x124   :  { %918 = vsyncpa [#allocation4], 1 }

</bundles_post_ra>
